<compile_context>
chip_gen: v5e
topology: v5e:2x2
jax: 0.10.0
libtpu: 0.0.40
codegen_flags: <defaults>
</compile_context>

<pallas_src>
import jax
import jax.numpy as jnp
from jax import lax
from jax.experimental import pallas as pl
from jax.experimental.pallas import tpu as pltpu

FEAT = 256
MAX_TILE_M = 512  # rows per grid step for large batches (multiple of 8)


def linear_add_kernel(x2_ref, w_ref, b_ref, x1_ref, o_ref):
    # x2_ref: (tile_m, 256) f32, w_ref: (256, 256) f32 in PyTorch (out, in)
    # layout, b_ref: (1, 256) f32, x1_ref: (tile_m, 256) f32.
    # y[m, o] = sum_k x2[m, k] * W[o, k]   (== x2 @ W^T) on the MXU, f32 acc.
    y = lax.dot_general(
        x2_ref[...], w_ref[...],
        dimension_numbers=(((1,), (1,)), ((), ())),
        preferred_element_type=jnp.float32,
    )
    # f32 epilogue: bias broadcast + residual add (VPU), hidden under the DMA.
    o_ref[...] = (y + b_ref[...] + x1_ref[...]).astype(o_ref.dtype)


def model_forward(x1, x2, weight, bias):
    """x1, x2: (B, 256, 1, 1) float32 (NCHW, like the PyTorch module).
    weight: (256, 256) PyTorch layout (out, in). bias: (256,).
    Returns linear(x2) + x1 with shape (B, 256, 1, 1) float32."""
    B = x2.shape[0]
    x1_2d = x1.reshape(B, FEAT)
    x2_2d = x2.reshape(B, FEAT)
    b2d = bias.reshape(1, FEAT)

    if B <= MAX_TILE_M:
        # Single full-extent block: no padding, no partial-block masking.
        tile_m = B
    else:
        # 512-row tiles (sublane-aligned); Pallas masks the final partial block.
        tile_m = MAX_TILE_M

    grid = (pl.cdiv(B, tile_m),)

    out = pl.pallas_call(
        linear_add_kernel,
        out_shape=jax.ShapeDtypeStruct((B, FEAT), jnp.float32),
        grid_spec=pltpu.PrefetchScalarGridSpec(
            num_scalar_prefetch=0,
            grid=grid,
            in_specs=[
                pl.BlockSpec((tile_m, FEAT), lambda i: (i, 0)),  # x2 (f32)
                pl.BlockSpec((FEAT, FEAT), lambda i: (0, 0)),    # weight, resident
                pl.BlockSpec((1, FEAT), lambda i: (0, 0)),       # bias, resident
                pl.BlockSpec((tile_m, FEAT), lambda i: (i, 0)),  # x1 (f32)
            ],
            out_specs=pl.BlockSpec((tile_m, FEAT), lambda i: (i, 0)),
        ),
        compiler_params=pltpu.CompilerParams(
            dimension_semantics=("parallel",),
        ),
    )(x2_2d, weight, b2d, x1_2d)

    return out.reshape(B, FEAT, 1, 1)


# TODO(synk): the PyTorch `if x1 < 0` truth-test on a 256-element tensor has no
# Pallas equivalent; it is elided because all three branches compute the same
# value (linear(x2) + x1), so the result is branch-invariant.


if __name__ == "__main__":
    key = jax.random.PRNGKey(0)
    k1, k2, kw, kb = jax.random.split(key, 4)

    B = 1
    # Inputs matching the module's (1, 256, 1, 1) tensors.
    x1 = jax.random.normal(k1, (B, FEAT, 1, 1), dtype=jnp.float32)
    x2 = jax.random.normal(k2, (B, FEAT, 1, 1), dtype=jnp.float32)

    # Deterministic Linear(256, 256) parameters (PyTorch layout: (out, in)).
    bound = 1.0 / (FEAT ** 0.5)
    weight = jax.random.uniform(kw, (FEAT, FEAT), minval=-bound, maxval=bound,
                                dtype=jnp.float32)
    bias = jax.random.uniform(kb, (FEAT,), minval=-bound, maxval=bound,
                              dtype=jnp.float32)

    out = model_forward(x1, x2, weight, bias)
    jax.block_until_ready(out)

    # Cross-check against plain-JAX f32 reference (full f32 -> tight tolerance).
    ref = (x2.reshape(B, FEAT) @ weight.T + bias + x1.reshape(B, FEAT)
           ).reshape(B, FEAT, 1, 1)
    assert out.shape == (B, FEAT, 1, 1)
    assert jnp.allclose(out, ref, atol=1e-4, rtol=1e-4), "mismatch vs reference"

    print("KERNEL_OK")
</pallas_src>

<mosaic_0001>
module attributes {stable_mosaic.version = 11 : i64} {
  func.func @linear_add_kernel(%arg0: i32, %arg1: memref<1x256xf32, #tpu.memory_space<vmem>>, %arg2: memref<256x256xf32, #tpu.memory_space<vmem>>, %arg3: memref<1x256xf32, #tpu.memory_space<vmem>>, %arg4: memref<1x256xf32, #tpu.memory_space<vmem>>, %arg5: memref<1x256xf32, #tpu.memory_space<vmem>>) attributes {dimension_semantics = [#tpu.dimension_semantics<parallel>], iteration_bounds = array<i64: 1>, scalar_prefetch = 0 : i64, scratch_operands = 0 : i64, tpu.core_type = #tpu.core_type<tc>, window_params = [{transform_indices = @transform_0, window_bounds = array<i64: 1, 256>}, {pipeline_mode = #tpu.pipeline_mode<synchronous>, transform_indices = @transform_1, window_bounds = array<i64: 256, 256>}, {pipeline_mode = #tpu.pipeline_mode<synchronous>, transform_indices = @transform_2, window_bounds = array<i64: 1, 256>}, {transform_indices = @transform_3, window_bounds = array<i64: 1, 256>}, {transform_indices = @transform_4, window_bounds = array<i64: 1, 256>}]} {
    %c0 = arith.constant 0 : index
    %c0_0 = arith.constant 0 : index
    %0 = vector.load %arg1[%c0, %c0_0] : memref<1x256xf32, #tpu.memory_space<vmem>>, vector<1x256xf32>
    %c0_1 = arith.constant 0 : index
    %c0_2 = arith.constant 0 : index
    %1 = vector.load %arg2[%c0_1, %c0_2] : memref<256x256xf32, #tpu.memory_space<vmem>>, vector<256x256xf32>
    %cst = arith.constant dense<0.000000e+00> : vector<1x256xf32>
    %2 = tpu.matmul %0, %1, %cst {dimension_numbers = #tpu.dot_dimension_numbers<[1], [1], [0], [0], [0, 0, 1, 0], [], []>} : vector<1x256xf32>, vector<256x256xf32>, vector<1x256xf32> -> vector<1x256xf32>
    %c0_3 = arith.constant 0 : index
    %c0_4 = arith.constant 0 : index
    %3 = vector.load %arg3[%c0_3, %c0_4] : memref<1x256xf32, #tpu.memory_space<vmem>>, vector<1x256xf32>
    %4 = arith.addf %2, %3 : vector<1x256xf32>
    %c0_5 = arith.constant 0 : index
    %c0_6 = arith.constant 0 : index
    %5 = vector.load %arg4[%c0_5, %c0_6] : memref<1x256xf32, #tpu.memory_space<vmem>>, vector<1x256xf32>
    %6 = arith.addf %4, %5 : vector<1x256xf32>
    %c0_7 = arith.constant 0 : index
    %c0_8 = arith.constant 0 : index
    %7 = vector.load %arg5[%c0_7, %c0_8] : memref<1x256xf32, #tpu.memory_space<vmem>>, vector<1x256xf32>
    tpu.vector_store %arg5[%c0_7, %c0_8], %6 {strides = array<i32>} : memref<1x256xf32, #tpu.memory_space<vmem>>, vector<1x256xf32>,
    return
  }
  func.func @transform_0(%arg0: i32) -> (i32, i32) {
    %c0_i32 = arith.constant 0 : i32
    %c0_i32_0 = arith.constant 0 : i32
    return %arg0, %c0_i32 : i32, i32
  }
  func.func @transform_1(%arg0: i32) -> (i32, i32) {
    %c0_i32 = arith.constant 0 : i32
    %c0_i32_0 = arith.constant 0 : i32
    %c0_i32_1 = arith.constant 0 : i32
    return %c0_i32, %c0_i32_0 : i32, i32
  }
  func.func @transform_2(%arg0: i32) -> (i32, i32) {
    %c0_i32 = arith.constant 0 : i32
    %c0_i32_0 = arith.constant 0 : i32
    %c0_i32_1 = arith.constant 0 : i32
    return %c0_i32, %c0_i32_0 : i32, i32
  }
  func.func @transform_3(%arg0: i32) -> (i32, i32) {
    %c0_i32 = arith.constant 0 : i32
    %c0_i32_0 = arith.constant 0 : i32
    return %arg0, %c0_i32 : i32, i32
  }
  func.func @transform_4(%arg0: i32) -> (i32, i32) {
    %c0_i32 = arith.constant 0 : i32
    %c0_i32_0 = arith.constant 0 : i32
    return %arg0, %c0_i32 : i32, i32
  }
}

</mosaic_0001>

<bundles_post_ra>
// kernel: tpu_custom_call.1
= control target key start
LH: loop header
LB: loop body
LE: loop exit
PB: predicated region body
PF: predicated region fallthrough
CT: control target
= control target key end

     0   :  { %9 = vsyncpa [#allocation3], 0  ;;  %s408_s0 = inlined_call_operand.hbm [shape: f32[1,256], index: 0, kind: input, shape index: {}]   ;;  %s409_s1 = inlined_call_operand.hbm [shape: f32[256,256], index: 1, kind: input, shape index: {}]   ;;  %s410_s2 = inlined_call_operand.hbm [shape: f32[1,256], index: 2, kind: input, shape index: {}]   ;;  %s411_s3 = inlined_call_operand.vmem [shape: f32[1,256], index: 3, kind: input, shape index: {}]   ;;  %s412_s4 = inlined_call_operand.hbm [shape: f32[1,256], index: 4, kind: output, shape index: {}]  }
   0x1   :  { %10 = vsyncpa [#allocation6], 0  ;;  %s27_s17 = sshll.u32 %s409_s1, 4  ;;  %s28_s17 = int_to_ptr.hbm [resolvable:$true] %s27_s17 }
   0x2   :  { %11 = vsyncpa [#allocation4], 0  ;;  %s362_s18 = smov [#allocation5]   ;;  %s17_s22 = sshll.u32 %s408_s0, 4  ;;  %s18_s22 = int_to_ptr.hbm [resolvable:$true] %s17_s22 }
   0x3   :  { %s29_s19 = sshll.u32 %s362_s18, 4  ;;  %s363_s23 = smov 256   ;;  %s30_s19 = int_to_ptr.vmem [resolvable:$true] %s29_s19 }
   0x4   :  { %s364_s24 = smov 16   ;;  %s365_s25 = smov [#allocation2]  }
   0x5   :  { %35 = dma.hbm_to_vmem [thread:$0]  %s28_s17, 8192, %s30_s19, [#allocation6], %s363_s23, %s363_s23, %s364_s24  }
   0x6   :  { %s19_s26 = sshll.u32 %s365_s25, 4  ;;  %s41_s29 = sshll.u32 %s410_s2, 4  ;;  %s20_s26 = int_to_ptr.vmem [resolvable:$true] %s19_s26  ;;  %s42_s29 = int_to_ptr.hbm [resolvable:$true] %s41_s29 }
   0x7   :  { %22 = dma.hbm_to_vmem [thread:$0]  %s18_s22, 32, %s20_s26, [#allocation3]  }
   0x8   :  { %s366_s1 = smov [#allocation7]  }
   0x9   :  { %s43_s30 = sshll.u32 %s366_s1, 4  ;;  %s44_s30 = int_to_ptr.vmem [resolvable:$true] %s43_s30 }
   0xa   :  { %46 = dma.hbm_to_vmem [thread:$0]  %s42_s29, 32, %s44_s30, [#allocation6]  }
   0xb   :  { %356 = dma.done.wait [#allocation3], 32  }
   0xc   :  { %357 = vsyncadd [#allocation3], 4294967264 }
   0xd   :  { %358 = dma.done.wait [#allocation6], 8224  }
   0xe   :  { %359 = vsyncadd [#allocation6], 4294959072  ;;  %v124_v0 = vld [vmem:[#allocation5 + $0x1f0] sm:$0xff]  ;;  %v125_v1 = vld [vmem:[#allocation5 + $0x1f8] sm:$0xff]  ;;  %s367_s5 = smov [#allocation8]   ;;  %s243_s9 = sshll.u32 %s412_s4, 4  ;;  %s244_s9 = int_to_ptr.hbm [resolvable:$true] %s243_s9 }
   0xf   :  { %177 = vmatpush.xpose.msra.mxu2 %v124_v0  ;;  %197 = vmatpush.xpose.msra.mxu3 %v125_v1  ;;  %v92_v2 = vld [vmem:[#allocation5 + $0xf0] sm:$0xff]  ;;  %v122_v3 = vld [vmem:[#allocation5 + $0x1e0] sm:$0xff]  ;;  %v123_v4 = vld [vmem:[#allocation5 + $0x1e8] sm:$0xff]  ;;  %s241_s6 = sshll.u32 %s367_s5, 4  ;;  %vm228_vm0 = vcmask 1040384   ;;  %s242_s6 = int_to_ptr.vmem [resolvable:$true] %s241_s6 }
  0x10   :  { %137 = vmatpush.xpose.msra.mxu0 %v92_v2  ;;  %v93_v5 = vld [vmem:[#allocation5 + $0xf8] sm:$0xff]  ;;  %v90_v6 = vld [vmem:[#allocation5 + $0xe0] sm:$0xff]  ;;  %v91_v7 = vld [vmem:[#allocation5 + $0xe8] sm:$0xff] }
  0x11   :  { %157 = vmatpush.xpose.msra.mxu1 %v93_v5  ;;  %v120_v8 = vld [vmem:[#allocation5 + $0x1d0] sm:$0xff]  ;;  %v121_v9 = vld [vmem:[#allocation5 + $0x1d8] sm:$0xff]  ;;  %v118_v12 = vld [vmem:[#allocation5 + $0x1c0] sm:$0xff] }
  0x12   :  { %v88_v10 = vld [vmem:[#allocation5 + $0xd0] sm:$0xff]  ;;  %v89_v11 = vld [vmem:[#allocation5 + $0xd8] sm:$0xff]  ;;  %v119_v13 = vld [vmem:[#allocation5 + $0x1c8] sm:$0xff] }
  0x13   :  { %178 = vmatpush.xpose.msra.mxu2 %v122_v3  ;;  %198 = vmatpush.xpose.msra.mxu3 %v123_v4  ;;  %v86_v14 = vld [vmem:[#allocation5 + $0xc0] sm:$0xff]  ;;  %v87_v15 = vld [vmem:[#allocation5 + $0xc8] sm:$0xff]  ;;  %v116_v16 = vld [vmem:[#allocation5 + $0x1b0] sm:$0xff] }
  0x14   :  { %138 = vmatpush.xpose.msra.mxu0 %v90_v6  ;;  %v117_v17 = vld [vmem:[#allocation5 + $0x1b8] sm:$0xff]  ;;  %v84_v18 = vld [vmem:[#allocation5 + $0xb0] sm:$0xff]  ;;  %v114_v20 = vld [vmem:[#allocation5 + $0x1a0] sm:$0xff] }
  0x15   :  { %158 = vmatpush.xpose.msra.mxu1 %v91_v7  ;;  %v85_v19 = vld [vmem:[#allocation5 + $0xb8] sm:$0xff]  ;;  %v115_v21 = vld [vmem:[#allocation5 + $0x1a8] sm:$0xff]  ;;  %v82_v22 = vld [vmem:[#allocation5 + $0xa0] sm:$0xff] }
  0x16   :  { %v83_v23 = vld [vmem:[#allocation5 + $0xa8] sm:$0xff]  ;;  %v112_v24 = vld [vmem:[#allocation5 + $0x190] sm:$0xff]  ;;  %v113_v25 = vld [vmem:[#allocation5 + $0x198] sm:$0xff] }
  0x17   :  { %179 = vmatpush.xpose.msra.mxu2 %v120_v8  ;;  %199 = vmatpush.xpose.msra.mxu3 %v121_v9  ;;  %v80_v26 = vld [vmem:[#allocation5 + $0x90] sm:$0xff]  ;;  %v81_v27 = vld [vmem:[#allocation5 + $0x98] sm:$0xff]  ;;  %v110_v28 = vld [vmem:[#allocation5 + $0x180] sm:$0xff] }
  0x18   :  { %139 = vmatpush.xpose.msra.mxu0 %v88_v10  ;;  %v111_v29 = vld [vmem:[#allocation5 + $0x188] sm:$0xff]  ;;  %v78_v30 = vld [vmem:[#allocation5 + $0x80] sm:$0xff]  ;;  %v108_v32 = vld [vmem:[#allocation5 + $0x170] sm:$0xff] }
  0x19   :  { %159 = vmatpush.xpose.msra.mxu1 %v89_v11  ;;  %v79_v31 = vld [vmem:[#allocation5 + $0x88] sm:$0xff]  ;;  %v109_v33 = vld [vmem:[#allocation5 + $0x178] sm:$0xff]  ;;  %v76_v34 = vld [vmem:[#allocation5 + $0x70] sm:$0xff] }
  0x1a   :  { %v77_v35 = vld [vmem:[#allocation5 + $0x78] sm:$0xff]  ;;  %v106_v36 = vld [vmem:[#allocation5 + $0x160] sm:$0xff]  ;;  %v107_v37 = vld [vmem:[#allocation5 + $0x168] sm:$0xff] }
  0x1b   :  { %180 = vmatpush.xpose.msra.mxu2 %v118_v12  ;;  %200 = vmatpush.xpose.msra.mxu3 %v119_v13  ;;  %v74_v38 = vld [vmem:[#allocation5 + $0x60] sm:$0xff]  ;;  %v75_v39 = vld [vmem:[#allocation5 + $0x68] sm:$0xff]  ;;  %v104_v40 = vld [vmem:[#allocation5 + $0x150] sm:$0xff] }
  0x1c   :  { %140 = vmatpush.xpose.msra.mxu0 %v86_v14  ;;  %v105_v41 = vld [vmem:[#allocation5 + $0x158] sm:$0xff]  ;;  %v72_v42 = vld [vmem:[#allocation5 + $0x50] sm:$0xff]  ;;  %v102_v44 = vld [vmem:[#allocation5 + $0x140] sm:$0xff] }
  0x1d   :  { %160 = vmatpush.xpose.msra.mxu1 %v87_v15  ;;  %v73_v43 = vld [vmem:[#allocation5 + $0x58] sm:$0xff]  ;;  %v103_v45 = vld [vmem:[#allocation5 + $0x148] sm:$0xff]  ;;  %v70_v46 = vld [vmem:[#allocation5 + $0x40] sm:$0xff] }
  0x1e   :  { %v71_v47 = vld [vmem:[#allocation5 + $0x48] sm:$0xff]  ;;  %v100_v48 = vld [vmem:[#allocation5 + $0x130] sm:$0xff]  ;;  %v101_v49 = vld [vmem:[#allocation5 + $0x138] sm:$0xff] }
  0x1f   :  { %181 = vmatpush.xpose.msra.mxu2 %v116_v16  ;;  %201 = vmatpush.xpose.msra.mxu3 %v117_v17  ;;  %v68_v50 = vld [vmem:[#allocation5 + $0x30] sm:$0xff]  ;;  %v69_v51 = vld [vmem:[#allocation5 + $0x38] sm:$0xff]  ;;  %v98_v52 = vld [vmem:[#allocation5 + $0x120] sm:$0xff]  ;;  %v231_v17 = vlaneseq }
  0x20   :  { %141 = vmatpush.xpose.msra.mxu0 %v84_v18  ;;  %v99_v53 = vld [vmem:[#allocation5 + $0x128] sm:$0xff]  ;;  %v66_v54 = vld [vmem:[#allocation5 + $0x20] sm:$0xff]  ;;  %v96_v56 = vld [vmem:[#allocation5 + $0x110] sm:$0xff] }
  0x21   :  { %161 = vmatpush.xpose.msra.mxu1 %v85_v19  ;;  %v67_v55 = vld [vmem:[#allocation5 + $0x28] sm:$0xff]  ;;  %v97_v57 = vld [vmem:[#allocation5 + $0x118] sm:$0xff]  ;;  %v64_v58 = vld [vmem:[#allocation5 + $0x10] sm:$0xff]  ;;  %vm233_vm1 = vcmp.lt.s32.totalorder %v231_v17, 256 }
  0x22   :  { %v65_v59 = vld [vmem:[#allocation5 + $0x18] sm:$0xff]  ;;  %v94_v61 = vld [vmem:[#allocation5 + $0x100] sm:$0xff]  ;;  %v95_v62 = vld [vmem:[#allocation5 + $0x108] sm:$0xff] }
  0x23   :  { %182 = vmatpush.xpose.msra.mxu2 %v114_v20  ;;  %202 = vmatpush.xpose.msra.mxu3 %v115_v21  ;;  %v61_v60 = vld [vmem:[#allocation2] sm:$0x3]  ;;  %v62_v63 = vld [vmem:[#allocation5] sm:$0xff]  ;;  %v63_v2 = vld [vmem:[#allocation5 + $0x8] sm:$0xff] }
  0x24   :  { %142 = vmatpush.xpose.msra.mxu0 %v82_v22  ;;  %v128_v0 = vperm.slane %v61_v60, 0  ;;  %v129_v1 = vperm.slane %v61_v60, 1  ;;  %v126_v3 = vld [vmem:[#allocation7] sm:$0x3]  ;;  %v217_v8 = vld [vmem:[%s411_s3] sm:$0x3] }
  0x25   :  { %162 = vmatpush.xpose.msra.mxu1 %v83_v23  ;;  %v133_v4 = vperm.slane %v126_v3, 0  ;;  %v134_v6 = vperm.slane %v126_v3, 1  ;;  %v220_v13 = vperm.slane %v217_v8, 1  ;;  %v219_v15 = vperm.slane %v217_v8, 0 }
  0x27   :  { %183 = vmatpush.xpose.msra.mxu2 %v112_v24  ;;  %203 = vmatpush.xpose.msra.mxu3 %v113_v25 }
  0x28   :  { %143 = vmatpush.xpose.msra.mxu0 %v80_v26 }
  0x29   :  { %163 = vmatpush.xpose.msra.mxu1 %v81_v27 }
  0x2b   :  { %184 = vmatpush.xpose.msra.mxu2 %v110_v28  ;;  %204 = vmatpush.xpose.msra.mxu3 %v111_v29 }
  0x2c   :  { %144 = vmatpush.xpose.msra.mxu0 %v78_v30 }
  0x2d   :  { %164 = vmatpush.xpose.msra.mxu1 %v79_v31 }
  0x2f   :  { %185 = vmatpush.xpose.msra.mxu2 %v108_v32  ;;  %205 = vmatpush.xpose.msra.mxu3 %v109_v33 }
  0x30   :  { %145 = vmatpush.xpose.msra.mxu0 %v76_v34 }
  0x31   :  { %165 = vmatpush.xpose.msra.mxu1 %v77_v35 }
  0x33   :  { %186 = vmatpush.xpose.msra.mxu2 %v106_v36  ;;  %206 = vmatpush.xpose.msra.mxu3 %v107_v37 }
  0x34   :  { %146 = vmatpush.xpose.msra.mxu0 %v74_v38 }
  0x35   :  { %166 = vmatpush.xpose.msra.mxu1 %v75_v39 }
  0x37   :  { %187 = vmatpush.xpose.msra.mxu2 %v104_v40  ;;  %207 = vmatpush.xpose.msra.mxu3 %v105_v41 }
  0x38   :  { %147 = vmatpush.xpose.msra.mxu0 %v72_v42 }
  0x39   :  { %167 = vmatpush.xpose.msra.mxu1 %v73_v43 }
  0x3b   :  { %188 = vmatpush.xpose.msra.mxu2 %v102_v44  ;;  %208 = vmatpush.xpose.msra.mxu3 %v103_v45 }
  0x3c   :  { %148 = vmatpush.xpose.msra.mxu0 %v70_v46 }
  0x3d   :  { %168 = vmatpush.xpose.msra.mxu1 %v71_v47 }
  0x3f   :  { %189 = vmatpush.xpose.msra.mxu2 %v100_v48  ;;  %209 = vmatpush.xpose.msra.mxu3 %v101_v49 }
  0x40   :  { %149 = vmatpush.xpose.msra.mxu0 %v68_v50 }
  0x41   :  { %169 = vmatpush.xpose.msra.mxu1 %v69_v51 }
  0x43   :  { %190 = vmatpush.xpose.msra.mxu2 %v98_v52  ;;  %210 = vmatpush.xpose.msra.mxu3 %v99_v53 }
  0x44   :  { %150 = vmatpush.xpose.msra.mxu0 %v66_v54 }
  0x45   :  { %170 = vmatpush.xpose.msra.mxu1 %v67_v55 }
  0x47   :  { %191 = vmatpush.xpose.msra.mxu2 %v96_v56  ;;  %211 = vmatpush.xpose.msra.mxu3 %v97_v57 }
  0x48   :  { %151 = vmatpush.xpose.msra.mxu0 %v64_v58 }
  0x49   :  { %171 = vmatpush.xpose.msra.mxu1 %v65_v59 }
  0x4b   :  { %192 = vmatpush.xpose.msra.mxu2 %v94_v61  ;;  %212 = vmatpush.xpose.msra.mxu3 %v95_v62 }
  0x4c   :  { %152 = vmatpush.xpose.msra.mxu0 %v62_v63 }
  0x4d   :  { %172 = vmatpush.xpose.msra.mxu1 %v63_v2 }
  0x4e   :  { %193 = vmatmul.f32.vlgmr.msra.gmra.mxu2 %v128_v0  ;;  %213 = vmatmul.f32.vlgmr.msra.gmra.mxu3 %v129_v1 }
  0x4f   :  { %153 = vmatmul.f32.vlgmr.msra.gmra.mxu0 %v128_v0 }
  0x50   :  { %173 = vmatmul.f32.vlgmr.msra.gmra.mxu1 %v129_v1 }
  0xcc   :  { %v154_v5 = vpop.f32.mrf.mxu0 }
  0xcd   :  { %v155_v7 = vadd.f32 %v154_v5, %v133_v4  ;;  %v174_v9 = vpop.f32.mrf.mxu1 }
  0xcf   :  { %v175_v14 = vadd.f32 %v174_v9, %v155_v7 }
  0xd1   :  { %v194_v10 = vpop.f32.mrf.mxu2  ;;  %v214_v11 = vpop.f32.mrf.mxu3  ;;  %v223_v19 = vadd.f32 %v219_v15, %v175_v14 }
  0xd2   :  { %v195_v12 = vadd.f32 %v194_v10, %v134_v6 }
  0xd4   :  { %v215_v16 = vadd.f32 %v214_v11, %v195_v12 }
  0xd6   :  { %v224_v18 = vadd.f32 %v220_v13, %v215_v16 }
  0xd8   :  { %v227_v20 = vrot.slane %v224_v18, 7 }
  0xda   :  { %v229_v21 = vsel %vm228_vm0, %v223_v19, %v227_v20 }
  0xdb   :  { %235 = vst.msk [vmem:[#allocation8] sm:$0x3] %vm233_vm1, %v229_v21 }
  0xdc   :  { %246 = dma.vmem_to_hbm [thread:$0]  %s242_s6, 32, %s244_s9, [#allocation4]  }
  0xdd   :  { %360 = dma.done.wait [#allocation4], 32  }
  0xde   :  { %361 = vsyncadd [#allocation4], 4294967264 }
  0xdf   :  { %251 = vsyncpa [#allocation3], 1 }
  0xe0   :  { %252 = vsyncpa [#allocation6], 1 }
  0xe1   :  { %253 = vsyncpa [#allocation4], 1 }

</bundles_post_ra>
